<compile_context>
chip_gen: v7x
topology: tpu7x:2x2x1
jax: 0.10.0
libtpu: 0.0.40
codegen_flags: <defaults>
</compile_context>

<pallas_src>
import functools

import jax
import jax.numpy as jnp
import numpy as np
from jax.experimental import pallas as pl
from jax.experimental.pallas import tpu as pltpu


def vqvae_enc_block(x_nchw, conv_w, conv_b, bn_gamma, bn_beta, bn_mean, bn_var,
                    *, eps=1e-5, compute_dtype=jnp.bfloat16,
                    out_dtype=jnp.bfloat16):
    N, C_in, H, W = x_nchw.shape
    C_out, _, KH, KW = conv_w.shape            # (3, 4)
    assert (KH, KW) == (3, 4), "VQVAEEncBlock uses kernel_size=(3,4)"
    H_out = H                                  # stride 1 / pad 1 / k 3 along H
    W_out = (W + 2 * 1 - KW) // 2 + 1          # stride 2 / pad 1 / k 4 along W

    # ---- glue: replicate pad + parity de-interleave + cast (one fused pass, --
    #      ~1x input bytes; no im2col).  Extra bottom row keeps the flattened
    #      layout's (discarded) per-row pad column in-bounds for the kw-shifted
    #      reads of the last valid row. --------------------------------------
    xp = jnp.pad(x_nchw, ((0, 0), (0, 0), (1, 2), (1, 1)), mode="edge")
    if xp.shape[-1] % 2:                       # make padded width even
        xp = jnp.pad(xp, ((0, 0), (0, 0), (0, 0), (0, 1)), mode="edge")
    H_slab = H + 3
    Wp1 = xp.shape[-1] // 2                    # >= W_out + 1
    # slab[n, q*C_in + c, h*Wp1 + p] = xpad[n, c, h, 2p + q]
    slab = xp.reshape(N, C_in, H_slab, Wp1, 2)         # [n, c, h, p, q]
    slab = jnp.transpose(slab, (0, 4, 1, 2, 3))        # [n, q, c, h, p]
    slab = slab.reshape(N, 2 * C_in, H_slab * Wp1).astype(compute_dtype)

    # ---- fold BN (running stats) scale into the weights; keep only a shift ---
    scale = bn_gamma / jnp.sqrt(bn_var + eps)                      # (C_out,)
    shift = (bn_beta + (conv_b - bn_mean) * scale).astype(jnp.float32)
    shift = shift.reshape(C_out, 1)
    wm = conv_w * scale[:, None, None, None]                       # (C_out,C_in,KH,KW)
    wm = jnp.transpose(wm, (2, 3, 1, 0))                           # (KH,KW,C_in,C_out)
    wm = wm.reshape(KH, 2, 2, C_in, C_out)                         # (kh, s, q, c, co)
    wm = jnp.transpose(wm, (0, 1, 4, 2, 3))                        # (kh, s, co, q, c)
    wm = wm.reshape(KH * 2, C_out, 2 * C_in).astype(compute_dtype) # kw = 2s + q

    M = H_out * Wp1                            # flattened output lanes per image
    L = H_slab * Wp1                           # flattened slab lanes per image

    def kernel(x_ref, w_ref, shift_ref, o_ref):
        # x_ref:     (2*C_in, L)      bf16   whole parity-split padded image
        # w_ref:     (6, C_out, 2C_in) bf16  BN-scale-folded conv weights
        # shift_ref: (C_out, 1)       f32    folded conv-bias / BN shift
        # o_ref:     (C_out, M)       bf16   flattened NCHW output (W padded by 1)
        acc = None
        for kh in range(KH):                           # static unroll (3)
            for s in range(2):                         # kw pair: kw = 2*s + parity
                start = kh * Wp1 + s                   # static lane offset
                part = jnp.dot(w_ref[2 * kh + s],
                               x_ref[:, start:start + M],
                               preferred_element_type=jnp.float32)
                acc = part if acc is None else acc + part
        y = acc + shift_ref[...]                       # BN shift, broadcast once
        y = jnp.maximum(y, 0.01 * y)                   # LeakyReLU via single vmax
        o_ref[...] = y.astype(o_ref.dtype)             # one lane-dense bf16 store

    # ---- VMEM budget (double-buffered slab + out blocks, f32 accumulator) ----
    itm = jnp.dtype(compute_dtype).itemsize
    slab_bytes = 2 * C_in * L * itm
    out_bytes = C_out * M * jnp.dtype(out_dtype).itemsize
    acc_bytes = C_out * M * 4
    rhs_bytes = 2 * C_in * M * itm
    vmem_need = (2 * slab_bytes + 2 * out_bytes + acc_bytes + 2 * rhs_bytes
                 + wm.size * itm + 4096)
    vmem_limit = int(min(max(2 * vmem_need, 32 * 2**20), 128 * 2**20))

    cost = pl.CostEstimate(
        flops=2 * N * H_out * W_out * C_out * KH * KW * C_in,
        transcendentals=0,
        bytes_accessed=int(N * slab_bytes + N * out_bytes + wm.size * itm
                           + C_out * 4))

    out_flat = pl.pallas_call(
        kernel,
        out_shape=jax.ShapeDtypeStruct((N, C_out, M), out_dtype),
        grid_spec=pltpu.PrefetchScalarGridSpec(
            num_scalar_prefetch=0,
            grid=(N,),
            in_specs=[
                pl.BlockSpec((pl.Squeezed(), 2 * C_in, L), lambda n: (n, 0, 0)),
                pl.BlockSpec((KH * 2, C_out, 2 * C_in), lambda n: (0, 0, 0)),
                pl.BlockSpec((C_out, 1), lambda n: (0, 0)),
            ],
            out_specs=pl.BlockSpec((pl.Squeezed(), C_out, M),
                                   lambda n: (n, 0, 0)),
        ),
        compiler_params=pltpu.CompilerParams(
            dimension_semantics=("parallel",),
            vmem_limit_bytes=vmem_limit),
        cost_estimate=cost,
    )(slab, wm, shift)

    # Free reshape (row-major contiguous) to NCHW with one pad column per row,
    # then trim the pad column.  Consumers that can accept the padded width can
    # take out_flat.reshape(N, C_out, H_out, Wp1) directly with zero extra HBM.
    out = out_flat.reshape(N, C_out, H_out, Wp1)[:, :, :, :W_out]
    return out


def _reference(x, conv_w, conv_b, gamma, beta, mean, var, eps=1e-5):
    # Pure-JAX f32 reference of the same forward pass (correctness check).
    xpad = jnp.pad(x, ((0, 0), (0, 0), (1, 1), (1, 1)), mode="edge")
    y = jax.lax.conv_general_dilated(
        xpad, conv_w, window_strides=(1, 2), padding="VALID",
        dimension_numbers=("NCHW", "OIHW", "NCHW"))
    y = y + conv_b.reshape(1, -1, 1, 1)
    y = (y - mean.reshape(1, -1, 1, 1)) / jnp.sqrt(var.reshape(1, -1, 1, 1) + eps)
    y = y * gamma.reshape(1, -1, 1, 1) + beta.reshape(1, -1, 1, 1)
    return jnp.where(y >= 0, y, 0.01 * y)


if __name__ == "__main__":
    key = jax.random.PRNGKey(0)
    k = jax.random.split(key, 7)

    N, C_in, H, W = 2, 4, 16, 16
    C_out = 8

    x = jax.random.normal(k[0], (N, C_in, H, W), jnp.float32)
    conv_w = jax.random.normal(k[1], (C_out, C_in, 3, 4), jnp.float32) * 0.1
    conv_b = jax.random.normal(k[2], (C_out,), jnp.float32) * 0.1
    gamma = jax.random.uniform(k[3], (C_out,), jnp.float32, 0.5, 1.5)
    beta = jax.random.normal(k[4], (C_out,), jnp.float32) * 0.1
    mean = jax.random.normal(k[5], (C_out,), jnp.float32) * 0.1
    var = jax.random.uniform(k[6], (C_out,), jnp.float32, 0.5, 1.5)

    fwd = jax.jit(functools.partial(vqvae_enc_block))
    out = fwd(x, conv_w, conv_b, gamma, beta, mean, var)
    out = jax.block_until_ready(out)

    assert out.shape == (N, C_out, H, W // 2), out.shape
    ref = _reference(x, conv_w, conv_b, gamma, beta, mean, var)
    # bf16 activations/weights/output (f32 accumulation) per the perf review,
    # so the tolerance vs. the pure-f32 reference is relaxed accordingly.
    np.testing.assert_allclose(np.asarray(out).astype(np.float32),
                               np.asarray(ref), atol=5e-2, rtol=5e-2)
    print("KERNEL_OK")
</pallas_src>

<mosaic_0001>
module attributes {stable_mosaic.version = 11 : i64} {
  func.func @kernel(%arg0: i32, %arg1: memref<1x8x171xbf16, #tpu.memory_space<vmem>>, %arg2: memref<6x8x8xbf16, #tpu.memory_space<vmem>>, %arg3: memref<8x1xf32, #tpu.memory_space<vmem>>, %arg4: memref<1x8x144xbf16, #tpu.memory_space<vmem>>) attributes {dimension_semantics = [#tpu.dimension_semantics<parallel>], iteration_bounds = array<i64: 2>, scalar_prefetch = 0 : i64, scratch_operands = 0 : i64, tpu.core_type = #tpu.core_type<tc>, window_params = [{transform_indices = @transform_0, window_bounds = array<i64: 1, 8, 171>}, {pipeline_mode = #tpu.pipeline_mode<synchronous>, transform_indices = @transform_1, window_bounds = array<i64: 6, 8, 8>}, {pipeline_mode = #tpu.pipeline_mode<synchronous>, transform_indices = @transform_2, window_bounds = array<i64: 8, 1>}, {transform_indices = @transform_3, window_bounds = array<i64: 1, 8, 144>}]} {
    %c0 = arith.constant 0 : index
    %c0_0 = arith.constant 0 : index
    %c0_1 = arith.constant 0 : index
    %0 = vector.load %arg2[%c0, %c0_0, %c0_1] : memref<6x8x8xbf16, #tpu.memory_space<vmem>>, vector<1x8x8xbf16>
    %1 = vector.shape_cast %0 : vector<1x8x8xbf16> to vector<8x8xbf16>
    %c0_2 = arith.constant 0 : index
    %c0_3 = arith.constant 0 : index
    %c0_4 = arith.constant 0 : index
    %2 = vector.load %arg1[%c0_2, %c0_3, %c0_4] : memref<1x8x171xbf16, #tpu.memory_space<vmem>>, vector<1x8x144xbf16>
    %3 = vector.shape_cast %2 : vector<1x8x144xbf16> to vector<8x144xbf16>
    %cst = arith.constant dense<0.000000e+00> : vector<8x144xf32>
    %4 = tpu.matmul %1, %3, %cst {dimension_numbers = #tpu.dot_dimension_numbers<[1], [0], [0], [1], [0, 0, 1, 1], [], []>} : vector<8x8xbf16>, vector<8x144xbf16>, vector<8x144xf32> -> vector<8x144xf32>
    %c1 = arith.constant 1 : index
    %c0_5 = arith.constant 0 : index
    %c0_6 = arith.constant 0 : index
    %5 = vector.load %arg2[%c1, %c0_5, %c0_6] : memref<6x8x8xbf16, #tpu.memory_space<vmem>>, vector<1x8x8xbf16>
    %6 = vector.shape_cast %5 : vector<1x8x8xbf16> to vector<8x8xbf16>
    %c0_7 = arith.constant 0 : index
    %c0_8 = arith.constant 0 : index
    %c1_9 = arith.constant 1 : index
    %7 = vector.load %arg1[%c0_7, %c0_8, %c1_9] : memref<1x8x171xbf16, #tpu.memory_space<vmem>>, vector<1x8x144xbf16>
    %8 = vector.shape_cast %7 : vector<1x8x144xbf16> to vector<8x144xbf16>
    %cst_10 = arith.constant dense<0.000000e+00> : vector<8x144xf32>
    %9 = tpu.matmul %6, %8, %cst_10 {dimension_numbers = #tpu.dot_dimension_numbers<[1], [0], [0], [1], [0, 0, 1, 1], [], []>} : vector<8x8xbf16>, vector<8x144xbf16>, vector<8x144xf32> -> vector<8x144xf32>
    %10 = arith.addf %4, %9 : vector<8x144xf32>
    %c2 = arith.constant 2 : index
    %c0_11 = arith.constant 0 : index
    %c0_12 = arith.constant 0 : index
    %11 = vector.load %arg2[%c2, %c0_11, %c0_12] : memref<6x8x8xbf16, #tpu.memory_space<vmem>>, vector<1x8x8xbf16>
    %12 = vector.shape_cast %11 : vector<1x8x8xbf16> to vector<8x8xbf16>
    %c0_13 = arith.constant 0 : index
    %c0_14 = arith.constant 0 : index
    %c9 = arith.constant 9 : index
    %13 = vector.load %arg1[%c0_13, %c0_14, %c9] : memref<1x8x171xbf16, #tpu.memory_space<vmem>>, vector<1x8x144xbf16>
    %14 = vector.shape_cast %13 : vector<1x8x144xbf16> to vector<8x144xbf16>
    %cst_15 = arith.constant dense<0.000000e+00> : vector<8x144xf32>
    %15 = tpu.matmul %12, %14, %cst_15 {dimension_numbers = #tpu.dot_dimension_numbers<[1], [0], [0], [1], [0, 0, 1, 1], [], []>} : vector<8x8xbf16>, vector<8x144xbf16>, vector<8x144xf32> -> vector<8x144xf32>
    %16 = arith.addf %10, %15 : vector<8x144xf32>
    %c3 = arith.constant 3 : index
    %c0_16 = arith.constant 0 : index
    %c0_17 = arith.constant 0 : index
    %17 = vector.load %arg2[%c3, %c0_16, %c0_17] : memref<6x8x8xbf16, #tpu.memory_space<vmem>>, vector<1x8x8xbf16>
    %18 = vector.shape_cast %17 : vector<1x8x8xbf16> to vector<8x8xbf16>
    %c0_18 = arith.constant 0 : index
    %c0_19 = arith.constant 0 : index
    %c10 = arith.constant 10 : index
    %19 = vector.load %arg1[%c0_18, %c0_19, %c10] : memref<1x8x171xbf16, #tpu.memory_space<vmem>>, vector<1x8x144xbf16>
    %20 = vector.shape_cast %19 : vector<1x8x144xbf16> to vector<8x144xbf16>
    %cst_20 = arith.constant dense<0.000000e+00> : vector<8x144xf32>
    %21 = tpu.matmul %18, %20, %cst_20 {dimension_numbers = #tpu.dot_dimension_numbers<[1], [0], [0], [1], [0, 0, 1, 1], [], []>} : vector<8x8xbf16>, vector<8x144xbf16>, vector<8x144xf32> -> vector<8x144xf32>
    %22 = arith.addf %16, %21 : vector<8x144xf32>
    %c4 = arith.constant 4 : index
    %c0_21 = arith.constant 0 : index
    %c0_22 = arith.constant 0 : index
    %23 = vector.load %arg2[%c4, %c0_21, %c0_22] : memref<6x8x8xbf16, #tpu.memory_space<vmem>>, vector<1x8x8xbf16>
    %24 = vector.shape_cast %23 : vector<1x8x8xbf16> to vector<8x8xbf16>
    %c0_23 = arith.constant 0 : index
    %c0_24 = arith.constant 0 : index
    %c18 = arith.constant 18 : index
    %25 = vector.load %arg1[%c0_23, %c0_24, %c18] : memref<1x8x171xbf16, #tpu.memory_space<vmem>>, vector<1x8x144xbf16>
    %26 = vector.shape_cast %25 : vector<1x8x144xbf16> to vector<8x144xbf16>
    %cst_25 = arith.constant dense<0.000000e+00> : vector<8x144xf32>
    %27 = tpu.matmul %24, %26, %cst_25 {dimension_numbers = #tpu.dot_dimension_numbers<[1], [0], [0], [1], [0, 0, 1, 1], [], []>} : vector<8x8xbf16>, vector<8x144xbf16>, vector<8x144xf32> -> vector<8x144xf32>
    %28 = arith.addf %22, %27 : vector<8x144xf32>
    %c5 = arith.constant 5 : index
    %c0_26 = arith.constant 0 : index
    %c0_27 = arith.constant 0 : index
    %29 = vector.load %arg2[%c5, %c0_26, %c0_27] : memref<6x8x8xbf16, #tpu.memory_space<vmem>>, vector<1x8x8xbf16>
    %30 = vector.shape_cast %29 : vector<1x8x8xbf16> to vector<8x8xbf16>
    %c0_28 = arith.constant 0 : index
    %c0_29 = arith.constant 0 : index
    %c19 = arith.constant 19 : index
    %31 = vector.load %arg1[%c0_28, %c0_29, %c19] : memref<1x8x171xbf16, #tpu.memory_space<vmem>>, vector<1x8x144xbf16>
    %32 = vector.shape_cast %31 : vector<1x8x144xbf16> to vector<8x144xbf16>
    %cst_30 = arith.constant dense<0.000000e+00> : vector<8x144xf32>
    %33 = tpu.matmul %30, %32, %cst_30 {dimension_numbers = #tpu.dot_dimension_numbers<[1], [0], [0], [1], [0, 0, 1, 1], [], []>} : vector<8x8xbf16>, vector<8x144xbf16>, vector<8x144xf32> -> vector<8x144xf32>
    %34 = arith.addf %28, %33 : vector<8x144xf32>
    %c0_31 = arith.constant 0 : index
    %c0_32 = arith.constant 0 : index
    %35 = vector.load %arg3[%c0_31, %c0_32] : memref<8x1xf32, #tpu.memory_space<vmem>>, vector<8x1xf32>
    %36 = vector.broadcast %35 : vector<8x1xf32> to vector<8x144xf32>
    %37 = arith.addf %34, %36 : vector<8x144xf32>
    %cst_33 = arith.constant 0.00999999977 : f32
    %38 = vector.broadcast %cst_33 : f32 to vector<8x144xf32>
    %39 = arith.mulf %38, %37 : vector<8x144xf32>
    %40 = arith.maximumf %37, %39 : vector<8x144xf32>
    %41 = arith.truncf %40 : vector<8x144xf32> to vector<8x144xbf16>
    %c0_34 = arith.constant 0 : index
    %c0_35 = arith.constant 0 : index
    %c0_36 = arith.constant 0 : index
    %42 = vector.load %arg4[%c0_34, %c0_35, %c0_36] : memref<1x8x144xbf16, #tpu.memory_space<vmem>>, vector<1x8x144xbf16>
    %43 = vector.shape_cast %42 : vector<1x8x144xbf16> to vector<8x144xbf16>
    %44 = vector.shape_cast %41 : vector<8x144xbf16> to vector<1x8x144xbf16>
    tpu.vector_store %arg4[%c0_34, %c0_35, %c0_36], %44 {strides = array<i32>} : memref<1x8x144xbf16, #tpu.memory_space<vmem>>, vector<1x8x144xbf16>,
    return
  }
  func.func @transform_0(%arg0: i32) -> (i32, i32, i32) {
    %c0_i32 = arith.constant 0 : i32
    %c0_i32_0 = arith.constant 0 : i32
    %c0_i32_1 = arith.constant 0 : i32
    return %arg0, %c0_i32, %c0_i32_0 : i32, i32, i32
  }
  func.func @transform_1(%arg0: i32) -> (i32, i32, i32) {
    %c0_i32 = arith.constant 0 : i32
    %c0_i32_0 = arith.constant 0 : i32
    %c0_i32_1 = arith.constant 0 : i32
    %c0_i32_2 = arith.constant 0 : i32
    return %c0_i32, %c0_i32_0, %c0_i32_1 : i32, i32, i32
  }
  func.func @transform_2(%arg0: i32) -> (i32, i32) {
    %c0_i32 = arith.constant 0 : i32
    %c0_i32_0 = arith.constant 0 : i32
    %c0_i32_1 = arith.constant 0 : i32
    return %c0_i32, %c0_i32_0 : i32, i32
  }
  func.func @transform_3(%arg0: i32) -> (i32, i32, i32) {
    %c0_i32 = arith.constant 0 : i32
    %c0_i32_0 = arith.constant 0 : i32
    %c0_i32_1 = arith.constant 0 : i32
    return %arg0, %c0_i32, %c0_i32_0 : i32, i32, i32
  }
}

</mosaic_0001>

<bundles_post_ra>
// kernel: vqvae_enc_block.1
= control target key start
LH: loop header
LB: loop body
LE: loop exit
PB: predicated region body
PF: predicated region fallthrough
CT: control target
= control target key end

     0   :  { %s692_s12 = smov 0   ;;  %s763_s0 = inlined_call_operand.vmem [shape: bf16[2,8,171], index: 0, kind: input, shape index: {}]   ;;  %s764_s1 = inlined_call_operand.vmem [shape: bf16[6,8,8], index: 1, kind: input, shape index: {}]   ;;  %s765_s2 = inlined_call_operand.vmem [shape: f32[8,1], index: 2, kind: input, shape index: {}]   ;;  %s766_s3 = inlined_call_operand.vmem [shape: bf16[2,8,144], index: 3, kind: output, shape index: {}]  }
   0x1 LB: > { %s607_s13 = sadd.s32 4294967295, %s664_s12   ;;  %p611_p0 = scmp.ge.s32.totalorder %s664_s12, 1  ;;  %s664_s12 = sphi %s692_s12, %s13_s12  }
   0x2   : > { %p137_p1 = scmp.lt.s32.totalorder %s664_s12, 3 }
   0x4   : > { %p138_p2 = pnand %p611_p0, %p137_p1 }
   0x5   : > { %p161_p3 = scmp.lt.s32.totalorder (!%p138_p2), %s607_s13, 1  ;;  %v666_v0 = vmov (!%p138_p2), 0   ;;  %vm191_vm0 = vcmask (!%p138_p2), 1043456   ;;  %s667_s18 = smov (!%p138_p2), 119   ;;  %vm187_vm1 = vcmask (!%p138_p2), 64512   ;;  %v529_v6 = vld [vmem:[%s765_s2] sm:$0xff] (!%p138_p2) }
   0x6   : > { %141 = sbr.rel (%p138_p2) target bundleno = 385 (0x181), region = 32  ;;  %230 = vmatprep.mubr.bf16.mxu0 (!%p138_p2), %v666_v0  ;;  %280 = vmatprep.mubr.bf16.mxu1 (!%p138_p2), %v666_v0  ;;  %s668_s19 = smov (!%p138_p2), 127   ;;  %v172_v5 = vld [vmem:[%s764_s1] sm:$0xf] (!%p138_p2)  ;;  %vm185_vm2 = vcmask (!%p138_p2), 1039360   ;;  %vm295_vm3 = vcmask (!%p138_p2), 973824  }
   0x7   : > { %655 = vset.pattern.permute.xlu0 (!%p138_p2), %v666_v0  ;;  %s669_s22 = smov (!%p138_p2), 118   ;;  %s670_s23 = smov (!%p138_p2), 110   ;;  %vm355_vm4 = vcmask (!%p138_p2), 965632   ;;  %v616_v14 = vld [vmem:[%s764_s1 + $0x4] sm:$0xf] (!%p138_p2)  ;;  %vm415_vm5 = vcmask (!%p138_p2), 900096  }
   0x8   : > { %s671_s24 = smov (!%p138_p2), 109   ;;  %v626_v20 = vld [vmem:[%s764_s1 + $0xc] sm:$0xf] (!%p138_p2)  ;;  %vm475_vm6 = vcmask (!%p138_p2), 891904   ;;  %v623_v24 = vld [vmem:[%s764_s1 + $0x8] sm:$0xf] (!%p138_p2) }
   0x9   : > { %v632_v30 = vld [vmem:[%s764_s1 + $0x14] sm:$0xf] (!%p138_p2)  ;;  %v629_v31 = vld [vmem:[%s764_s1 + $0x10] sm:$0xf] (!%p138_p2)  ;;  %vm549_vm7 = vcmask (!%p138_p2), 130052  }
   0xa   : > { %vm550_vm8 = vmor (!%p138_p2), %vm549_vm7, %vm191_vm0 }
   0xd   : > { %s768_s13 = smov (!%p161_p3, %s607_s13), 1 }
   0xe   : > { %s638_s14 = sshll.u32 %s768_s13, 3 }
   0xf   : > { %s165_s17 = scalar_lea.vmem %s763_s0, %s638_s14  ;;  %s170_s15 = scalar_lea.vmem %s766_s3, %s638_s14 }
  0x10   : > { %v173_v1 = vld [vmem:[%s165_s17] sm:$0xff] }
  0x11   : > { %v617_v2 = vcombine.low %v173_v1, %v173_v1  ;;  %v618_v3 = vcombine.high %v173_v1, %v173_v1 }
  0x13   : > { %291 = vrot.lane.b32.xlu1 %v617_v2, %s667_s18  ;;  %181 = vrot.lane.b32.xlu0 %v617_v2, %s668_s19  ;;  %v243_v4 = vsel %vm191_vm0, %v617_v2, 0 }
  0x14   : > { %621 = vmatprep.subr.msk.bf16.mxu1 %vm191_vm0, %v618_v3 }
  0x15   : > { %249 = vmatpush1.bf16.msra.mxu1 %v243_v4 }
  0x17   : > { %293 = vrot.lane.b32.xlu1 %v618_v3, %s667_s18  ;;  %183 = vrot.lane.b32.xlu0 %v618_v3, %s668_s19 }
  0x18   : > { %622 = vmatmul.mubr.msk.bf16.vlgmr.msra.gmra.mrb[0].mxu1 %vm187_vm1, %v172_v5 }
  0x19   : > { %398 = vmatprep.mubr.bf16.mxu1 %v666_v0 }
  0x1b   : > { %353 = vrot.lane.b32.xlu1 %v618_v3, %s669_s22  ;;  %351 = vrot.lane.b32.xlu0 %v617_v2, %s669_s22 }
  0x1f   : > { %413 = vrot.lane.b32.xlu1 %v618_v3, %s670_s23  ;;  %411 = vrot.lane.b32.xlu0 %v617_v2, %s670_s23 }
  0x23   : > { %473 = vrot.lane.b32.xlu1 %v618_v3, %s671_s24  ;;  %471 = vrot.lane.b32.xlu0 %v617_v2, %s671_s24 }
  0x27   : > { %532 = vperm.xlu0 %655, %v529_v6  }
  0x85   : > { %v292_v7 = vpop.permute.xlu1 %291  ;;  %v182_v8 = vpop.permute.xlu0 %181 }
  0x89   : > { %v294_v9 = vpop.permute.xlu1 %293  ;;  %v184_v10 = vpop.permute.xlu0 %183 }
  0x8a   : > { %619 = vmatprep.subr.msk.bf16.mxu0 %vm191_vm0, %v184_v10  ;;  %v186_v11 = vsel %vm185_vm2, %v182_v8, %v184_v10  ;;  %v296_v13 = vsel %vm295_vm3, %v292_v7, %v294_v9 }
  0x8b   : > { %v193_v12 = vsel %vm191_vm0, %v186_v11, 0  ;;  %v301_v18 = vsel %vm191_vm0, %v296_v13, 0 }
  0x8c   : > { %199 = vmatpush1.bf16.msra.mxu0 %v193_v12 }
  0x8d   : > { %624 = vmatprep.subr.msk.bf16.mxu0 %vm191_vm0, %v294_v9  ;;  %v354_v15 = vpop.permute.xlu1 %353  ;;  %v352_v16 = vpop.permute.xlu0 %351 }
  0x8e   : > { %v356_v17 = vsel %vm355_vm4, %v352_v16, %v354_v15  ;;  %627 = vmatprep.subr.msk.bf16.mxu1 %vm191_vm0, %v354_v15 }
  0x8f   : > { %620 = vmatmul.mubr.msk.bf16.vlgmr.msra.gmra.mrb[0].mxu0 %vm187_vm1, %v616_v14  ;;  %v361_v19 = vsel %vm191_vm0, %v356_v17, 0 }
  0x90   : > { %307 = vmatpush1.bf16.msra.mxu0 %v301_v18  ;;  %367 = vmatpush1.bf16.msra.mxu1 %v361_v19 }
  0x91   : > { %v414_v21 = vpop.permute.xlu1 %413  ;;  %v412_v22 = vpop.permute.xlu0 %411  ;;  %338 = vmatprep.mubr.bf16.mxu0 %v666_v0 }
  0x92   : > { %v416_v23 = vsel %vm415_vm5, %v412_v22, %v414_v21  ;;  %630 = vmatprep.subr.msk.bf16.mxu0 %vm191_vm0, %v414_v21 }
  0x93   : > { %628 = vmatmul.mubr.msk.bf16.vlgmr.msra.gmra.mrb[4].mxu1 %vm187_vm1, %v626_v20  ;;  %v421_v25 = vsel %vm191_vm0, %v416_v23, 0 }
  0x94   : > { %518 = vmatprep.mubr.bf16.mxu1 %v666_v0 }
  0x95   : > { %v474_v26 = vpop.permute.xlu1 %473  ;;  %v472_v27 = vpop.permute.xlu0 %471 }
  0x96   : > { %v476_v28 = vsel %vm475_vm6, %v472_v27, %v474_v26  ;;  %633 = vmatprep.subr.msk.bf16.mxu1 %vm191_vm0, %v474_v26 }
  0x97   : > { %625 = vmatmul.mubr.msk.bf16.vlgmr.msra.gmra.mrb[4].mxu0 %vm187_vm1, %v623_v24  ;;  %v481_v29 = vsel %vm191_vm0, %v476_v28, 0 }
  0x98   : > { %427 = vmatpush1.bf16.msra.mxu0 %v421_v25  ;;  %487 = vmatpush1.bf16.msra.mxu1 %v481_v29 }
  0x99   : > { %458 = vmatprep.mubr.bf16.mxu0 %v666_v0 }
  0x9b   : > { %634 = vmatmul.mubr.msk.bf16.vlgmr.msra.gmra.mrb[8].mxu1 %vm187_vm1, %v632_v30 }
  0x9f   : > { %631 = vmatmul.mubr.msk.bf16.vlgmr.msra.gmra.mrb[8].mxu0 %vm187_vm1, %v629_v31 }
  0xa6   : > { %v533_v63 = vpop.permute.xlu0 %532 }
  0xeb   : > { %v282_v32 = vpop.f32.mrb[0].mxu1 }
  0xec   : > { %v284_v33 = vpop.f32.mrb[1].mxu1 }
  0xed   : > { %v286_v34 = vpop.f32.mrb[2].mxu1 }
  0xee   : > { %v287_v35 = vpop.f32.mrb[3].mxu1 }
 0x162   : > { %v232_v36 = vpop.f32.mrb[0].mxu0 }
 0x163   : > { %v283_v37 = vadd.f32 %v282_v32, %v232_v36  ;;  %v234_v38 = vpop.f32.mrb[1].mxu0 }
 0x164   : > { %v285_v39 = vadd.f32 %v284_v33, %v234_v38  ;;  %v236_v40 = vpop.f32.mrb[2].mxu0 }
 0x165   : > { %v237_v41 = vpop.f32.mrb[3].mxu0 }
 0x166   : > { %v400_v42 = vpop.f32.mrb[4].mxu1 }
 0x167   : > { %v402_v43 = vpop.f32.mrb[5].mxu1 }
 0x168   : > { %v404_v44 = vpop.f32.mrb[6].mxu1 }
 0x169   : > { %v405_v45 = vpop.f32.mrb[7].mxu1 }
 0x16a   : > { %v340_v46 = vpop.f32.mrb[4].mxu0 }
 0x16b   : > { %v347_v47 = vadd.f32 %v340_v46, %v283_v37  ;;  %v342_v48 = vpop.f32.mrb[5].mxu0 }
 0x16c   : > { %v348_v49 = vadd.f32 %v342_v48, %v285_v39  ;;  %v344_v50 = vpop.f32.mrb[6].mxu0 }
 0x16d   : > { %v407_v51 = vadd.f32 %v400_v42, %v347_v47  ;;  %v345_v52 = vpop.f32.mrb[7].mxu0 }
 0x16e   : > { %v408_v53 = vadd.f32 %v402_v43, %v348_v49  ;;  %v520_v54 = vpop.f32.mrb[8].mxu1 }
 0x16f   : > { %v522_v55 = vpop.f32.mrb[9].mxu1 }
 0x170   : > { %v524_v56 = vpop.f32.mrb[10].mxu1 }
 0x171   : > { %v525_v57 = vpop.f32.mrb[11].mxu1 }
 0x172   : > { %v460_v58 = vpop.f32.mrb[8].mxu0 }
 0x173   : > { %v467_v59 = vadd.f32 %v460_v58, %v407_v51  ;;  %v462_v60 = vpop.f32.mrb[9].mxu0 }
 0x174   : > { %v468_v61 = vadd.f32 %v462_v60, %v408_v53  ;;  %v464_v62 = vpop.f32.mrb[10].mxu0 }
 0x175   : > { %v527_v0 = vadd.f32 %v520_v54, %v467_v59  ;;  %v465_v1 = vpop.f32.mrb[11].mxu0 }
 0x176   : > { %v528_v2 = vadd.f32 %v522_v55, %v468_v61 }
 0x177   : > { %v535_v3 = vadd.f32 %v533_v63, %v527_v0 }
 0x178   : > { %v536_v4 = vadd.f32 %v533_v63, %v528_v2 }
 0x179   : > { %v537_v5 = vmul.f32 0.01, %v535_v3 }
 0x17a   : > { %v538_v6 = vmul.f32 0.01, %v536_v4 }
 0x17b   : > { %v539_v7 = vmax.f32 %v535_v3, %v537_v5 }
 0x17c   : > { %v540_v8 = vmax.f32 %v536_v4, %v538_v6 }
 0x17e   : > { %v640_v9 = vpack.c.bf16 %v540_v8, %v539_v7 }
 0x180   : > { %551 = vst.msk [vmem:[%s170_s15] sm:$0xff] %vm550_vm8, %v640_v9 }
 0x181 PF: > { %s13_s12 = sadd.s32 1, %s664_s12  }
 0x182   : > { %p10_p4 = scmp.ge.s32.totalorder %s13_s12, 4  }
 0x184   :  { %12 = sbr.rel (!%p10_p4) target bundleno = 1 (0x1), region = 67 }

</bundles_post_ra>
